<compile_context>
chip_gen: v7x
topology: tpu7x:2x2x1
jax: 0.10.0
libtpu: 0.0.40
codegen_flags: <defaults>
</compile_context>

<pallas_src>
import jax
import jax.numpy as jnp
import numpy as np
from jax.experimental import pallas as pl
from jax.experimental.pallas import tpu as pltpu


def _round_up(x, m):
    return ((x + m - 1) // m) * m


def _choose_tb(B):
    """Pick the batch (M) tile size.

    Tiny batches run as a single padded tile.  Larger batches pick from
    {128, 256, 512}, preferring (1) >=2 grid steps (v7x two-TC sharding of the
    "parallel" batch axis), (2) minimal padded rows, (3) the largest tile
    (grid-step overhead amortization).  Capped at 512 for v5e.
    """
    single = _round_up(max(B, 8), 8)
    if single <= 256:
        return single
    best_tb, best_key = None, None
    for tb in (128, 256, 512):
        b_pad = _round_up(B, tb)
        key = (b_pad // tb < 2, b_pad - B, -tb)
        if best_key is None or key < best_key:
            best_tb, best_key = tb, key
    return best_tb


# ---------------------------------------------------------------------------
# Pallas kernel: fused Linear + ConvT1 (as matmul) + ConvT2 (as matmul)
# ---------------------------------------------------------------------------
def decoder_kernel(x_ref, w1_ref, b1_ref, wc1_ref, bc1_ref, m2_ref, b2_ref,
                   out_ref):
    # Linear + ReLU -> (TB, L).  bf16 x bf16 MXU matmul, f32 accumulation.
    h1 = jnp.dot(x_ref[...].astype(w1_ref.dtype), w1_ref[...],
                 preferred_element_type=jnp.float32)
    h1 = jnp.maximum(h1 + b1_ref[...], 0.0)

    # ConvTranspose2d(L->L, k=4, s=1) on a 1x1 input is a pure matmul:
    # (TB, L) @ (L, L*16) -> (TB, L*16).
    h2 = jnp.dot(h1.astype(wc1_ref.dtype), wc1_ref[...],
                 preferred_element_type=jnp.float32)
    h2 = jnp.maximum(h2 + bc1_ref[...], 0.0)

    # ConvTranspose2d(L->C, k=4, s=2) as a dense scatter matrix whose column
    # dim is lane-padded to a multiple of 128 (zero columns past C*10*10).
    out = jnp.dot(h2.astype(m2_ref.dtype), m2_ref[...],
                  preferred_element_type=jnp.float32)
    out_ref[...] = (out + b2_ref[...]).astype(out_ref.dtype)


def decoder_forward(x, packed, out_dtype=jnp.float32):
    (w1t, b1, wc1, bc1, m2, b2, L, C, HOUT, NOUT_PAD) = packed
    B = x.shape[0]
    H1K2 = wc1.shape[1]          # L * 16
    NOUT = C * HOUT * HOUT       # 400 (unpadded)

    TB = _choose_tb(B)
    B_pad = _round_up(B, TB)
    if B_pad != B:
        x = jnp.pad(x, ((0, B_pad - B), (0, 0)))

    out_flat = pl.pallas_call(
        decoder_kernel,
        out_shape=jax.ShapeDtypeStruct((B_pad, NOUT_PAD), out_dtype),
        grid_spec=pltpu.PrefetchScalarGridSpec(
            num_scalar_prefetch=0,
            grid=(B_pad // TB,),
            in_specs=[
                pl.BlockSpec((TB, L), lambda i: (i, 0)),           # x (streamed)
                pl.BlockSpec((L, L), lambda i: (0, 0)),            # W1^T (bf16, resident)
                pl.BlockSpec((1, L), lambda i: (0, 0)),            # b1
                pl.BlockSpec((L, H1K2), lambda i: (0, 0)),         # convT1 W (bf16)
                pl.BlockSpec((1, H1K2), lambda i: (0, 0)),         # convT1 bias
                pl.BlockSpec((H1K2, NOUT_PAD), lambda i: (0, 0)),  # convT2 scatter (bf16)
                pl.BlockSpec((1, NOUT_PAD), lambda i: (0, 0)),     # convT2 bias (padded)
            ],
            out_specs=pl.BlockSpec((TB, NOUT_PAD), lambda i: (i, 0)),
        ),
        compiler_params=pltpu.CompilerParams(
            dimension_semantics=("parallel",),
            vmem_limit_bytes=48 * 1024 * 1024,
        ),
    )(x, w1t, b1, wc1, bc1, m2, b2)

    # glue: drop batch / lane padding and reshape back to NCHW
    return out_flat[:B, :NOUT].reshape(B, C, HOUT, HOUT)


# ---------------------------------------------------------------------------
# Parameter construction (deterministic; packing done host-side with numpy)
# ---------------------------------------------------------------------------
def make_params(key, channel_size, latent_size):
    L, C, K, S = latent_size, channel_size, 4, 2
    k1, k2, k3, k4, k5, k6 = jax.random.split(key, 6)

    # nn.Linear(L, L)
    lin_w = jax.random.normal(k1, (L, L), jnp.float32) * 0.1
    lin_b = jax.random.normal(k2, (L,), jnp.float32) * 0.1
    # nn.ConvTranspose2d(L, L, k=4, s=1): weight (in, out, 4, 4)
    ct1_w = jax.random.normal(k3, (L, L, K, K), jnp.float32) * 0.1
    ct1_b = jax.random.normal(k4, (L,), jnp.float32) * 0.1
    # nn.ConvTranspose2d(L, C, k=4, s=2): weight (in, out, 4, 4)
    ct2_w = jax.random.normal(k5, (L, C, K, K), jnp.float32) * 0.1
    ct2_b = jax.random.normal(k6, (C,), jnp.float32) * 0.1

    H1 = K                                   # spatial size after conv1 = 4
    HOUT = (H1 - 1) * S + K                  # 10
    NOUT = C * HOUT * HOUT                   # 400
    NOUT_PAD = _round_up(NOUT, 128)          # 512 (lane-dense output)

    # --- kernel-friendly packed forms (bf16 weights, f32 biases) ---
    w1t = jnp.asarray(lin_w.T, dtype=jnp.bfloat16)       # (L, L)
    b1 = lin_b.reshape(1, L)                              # (1, L) f32

    # ConvT1: (in, out, 4, 4) -> (in, out*16), column order (o, ky, kx)
    wc1 = jnp.asarray(ct1_w.reshape(L, L * K * K), dtype=jnp.bfloat16)
    bc1 = jnp.asarray(
        np.broadcast_to(np.asarray(ct1_b)[:, None], (L, H1 * H1))
        .reshape(1, L * H1 * H1).astype(np.float32))

    # ConvT2 dense scatter matrix with zero-padded columns, built in numpy.
    # out_flat[b,(o,oy,ox)] = sum_{(c,iy,ix)} h2[b,(c,iy,ix)] * M2[(c,iy,ix),(o,oy,ox)]
    ct2_w_np = np.asarray(ct2_w)
    m2_np = np.zeros((L * H1 * H1, NOUT_PAD), np.float32)
    for iy in range(H1):
        for ix in range(H1):
            for ky in range(K):
                for kx in range(K):
                    oy, ox = S * iy + ky, S * ix + kx
                    rows = np.arange(L) * (H1 * H1) + iy * H1 + ix
                    cols = np.arange(C) * (HOUT * HOUT) + oy * HOUT + ox
                    m2_np[rows[:, None], cols[None, :]] += ct2_w_np[:, :, ky, kx]
    m2 = jnp.asarray(m2_np, dtype=jnp.bfloat16)

    b2_np = np.zeros((1, NOUT_PAD), np.float32)
    b2_np[0, :NOUT] = np.broadcast_to(
        np.asarray(ct2_b)[:, None], (C, HOUT * HOUT)).reshape(NOUT)
    b2 = jnp.asarray(b2_np)

    raw = (lin_w, lin_b, ct1_w, ct1_b, ct2_w, ct2_b)
    packed = (w1t, b1, wc1, bc1, m2, b2, L, C, HOUT, NOUT_PAD)
    return raw, packed


# ---------------------------------------------------------------------------
# Pure-JAX reference (mirrors the PyTorch module semantics, full f32)
# ---------------------------------------------------------------------------
def conv_transpose_ref(x, w, b, stride):
    B, Cin, H, W = x.shape
    _, Cout, K, _ = w.shape
    Hout = (H - 1) * stride + K
    out = jnp.zeros((B, Cout, Hout, Hout), jnp.float32)
    for ky in range(K):
        for kx in range(K):
            contrib = jnp.einsum('bchw,co->bohw', x, w[:, :, ky, kx])
            out = out.at[:, :, ky:ky + stride * H:stride,
                              kx:kx + stride * W:stride].add(contrib)
    return out + b[None, :, None, None]


def decoder_ref(x, raw):
    lin_w, lin_b, ct1_w, ct1_b, ct2_w, ct2_b = raw
    h = jnp.maximum(x @ lin_w.T + lin_b, 0.0)
    h = h[:, :, None, None]                  # Unflatten -> (B, L, 1, 1)
    h = jnp.maximum(conv_transpose_ref(h, ct1_w, ct1_b, stride=1), 0.0)
    return conv_transpose_ref(h, ct2_w, ct2_b, stride=2)


# ---------------------------------------------------------------------------
if __name__ == "__main__":
    channel_size = 4
    latent_size = 32
    batch = 2

    key = jax.random.PRNGKey(0)
    kx, kp, kx2 = jax.random.split(key, 3)
    raw, packed = make_params(kp, channel_size, latent_size)

    # --- small-batch path (single padded tile) ---
    x = jax.random.normal(kx, (batch, latent_size), jnp.float32)
    out = decoder_forward(x, packed)
    out = jax.block_until_ready(out)
    ref = decoder_ref(x, raw)
    assert out.shape == (batch, channel_size, 10, 10), out.shape
    # bf16 weights (f32 accumulation) => relaxed tolerance vs. all-f32 ref.
    max_err = float(jnp.max(jnp.abs(out - ref)))
    assert jnp.allclose(out, ref, atol=2e-2, rtol=2e-2), max_err

    # --- large-batch path (TB=512, 2 "parallel" grid steps) ---
    big_batch = 1024
    x_big = jax.random.normal(kx2, (big_batch, latent_size), jnp.float32)
    out_big = jax.block_until_ready(decoder_forward(x_big, packed))
    ref_big = decoder_ref(x_big, raw)
    assert out_big.shape == (big_batch, channel_size, 10, 10), out_big.shape
    max_err_big = float(jnp.max(jnp.abs(out_big - ref_big)))
    assert jnp.allclose(out_big, ref_big, atol=2e-2, rtol=2e-2), max_err_big

    print("KERNEL_OK")
</pallas_src>

<mosaic_0001>
module attributes {stable_mosaic.version = 11 : i64} {
  func.func @decoder_kernel(%arg0: i32, %arg1: memref<8x32xf32, #tpu.memory_space<vmem>>, %arg2: memref<32x32xbf16, #tpu.memory_space<vmem>>, %arg3: memref<1x32xf32, #tpu.memory_space<vmem>>, %arg4: memref<32x512xbf16, #tpu.memory_space<vmem>>, %arg5: memref<1x512xf32, #tpu.memory_space<vmem>>, %arg6: memref<512x512xbf16, #tpu.memory_space<vmem>>, %arg7: memref<1x512xf32, #tpu.memory_space<vmem>>, %arg8: memref<8x512xf32, #tpu.memory_space<vmem>>) attributes {dimension_semantics = [#tpu.dimension_semantics<parallel>], iteration_bounds = array<i64: 1>, scalar_prefetch = 0 : i64, scratch_operands = 0 : i64, tpu.core_type = #tpu.core_type<tc>, window_params = [{transform_indices = @transform_0, window_bounds = array<i64: 8, 32>}, {pipeline_mode = #tpu.pipeline_mode<synchronous>, transform_indices = @transform_1, window_bounds = array<i64: 32, 32>}, {pipeline_mode = #tpu.pipeline_mode<synchronous>, transform_indices = @transform_2, window_bounds = array<i64: 1, 32>}, {pipeline_mode = #tpu.pipeline_mode<synchronous>, transform_indices = @transform_3, window_bounds = array<i64: 32, 512>}, {pipeline_mode = #tpu.pipeline_mode<synchronous>, transform_indices = @transform_4, window_bounds = array<i64: 1, 512>}, {pipeline_mode = #tpu.pipeline_mode<synchronous>, transform_indices = @transform_5, window_bounds = array<i64: 512, 512>}, {pipeline_mode = #tpu.pipeline_mode<synchronous>, transform_indices = @transform_6, window_bounds = array<i64: 1, 512>}, {transform_indices = @transform_7, window_bounds = array<i64: 8, 512>}]} {
    %c0 = arith.constant 0 : index
    %c0_0 = arith.constant 0 : index
    %0 = vector.load %arg1[%c0, %c0_0] : memref<8x32xf32, #tpu.memory_space<vmem>>, vector<8x32xf32>
    %1 = arith.truncf %0 : vector<8x32xf32> to vector<8x32xbf16>
    %c0_1 = arith.constant 0 : index
    %c0_2 = arith.constant 0 : index
    %2 = vector.load %arg2[%c0_1, %c0_2] : memref<32x32xbf16, #tpu.memory_space<vmem>>, vector<32x32xbf16>
    %cst = arith.constant dense<0.000000e+00> : vector<8x32xf32>
    %3 = tpu.matmul %1, %2, %cst {dimension_numbers = #tpu.dot_dimension_numbers<[1], [0], [0], [1], [0, 0, 1, 1], [], []>} : vector<8x32xbf16>, vector<32x32xbf16>, vector<8x32xf32> -> vector<8x32xf32>
    %c0_3 = arith.constant 0 : index
    %c0_4 = arith.constant 0 : index
    %4 = vector.load %arg3[%c0_3, %c0_4] : memref<1x32xf32, #tpu.memory_space<vmem>>, vector<1x32xf32>
    %5 = vector.broadcast %4 : vector<1x32xf32> to vector<8x32xf32>
    %6 = arith.addf %3, %5 : vector<8x32xf32>
    %cst_5 = arith.constant 0.000000e+00 : f32
    %7 = vector.broadcast %cst_5 : f32 to vector<8x32xf32>
    %8 = arith.maximumf %6, %7 : vector<8x32xf32>
    %9 = arith.truncf %8 : vector<8x32xf32> to vector<8x32xbf16>
    %c0_6 = arith.constant 0 : index
    %c0_7 = arith.constant 0 : index
    %10 = vector.load %arg4[%c0_6, %c0_7] : memref<32x512xbf16, #tpu.memory_space<vmem>>, vector<32x512xbf16>
    %cst_8 = arith.constant dense<0.000000e+00> : vector<8x512xf32>
    %11 = tpu.matmul %9, %10, %cst_8 {dimension_numbers = #tpu.dot_dimension_numbers<[1], [0], [0], [1], [0, 0, 1, 1], [], []>} : vector<8x32xbf16>, vector<32x512xbf16>, vector<8x512xf32> -> vector<8x512xf32>
    %c0_9 = arith.constant 0 : index
    %c0_10 = arith.constant 0 : index
    %12 = vector.load %arg5[%c0_9, %c0_10] : memref<1x512xf32, #tpu.memory_space<vmem>>, vector<1x512xf32>
    %13 = vector.broadcast %12 : vector<1x512xf32> to vector<8x512xf32>
    %14 = arith.addf %11, %13 : vector<8x512xf32>
    %cst_11 = arith.constant 0.000000e+00 : f32
    %15 = vector.broadcast %cst_11 : f32 to vector<8x512xf32>
    %16 = arith.maximumf %14, %15 : vector<8x512xf32>
    %17 = arith.truncf %16 : vector<8x512xf32> to vector<8x512xbf16>
    %c0_12 = arith.constant 0 : index
    %c0_13 = arith.constant 0 : index
    %18 = vector.load %arg6[%c0_12, %c0_13] : memref<512x512xbf16, #tpu.memory_space<vmem>>, vector<512x512xbf16>
    %cst_14 = arith.constant dense<0.000000e+00> : vector<8x512xf32>
    %19 = tpu.matmul %17, %18, %cst_14 {dimension_numbers = #tpu.dot_dimension_numbers<[1], [0], [0], [1], [0, 0, 1, 1], [], []>} : vector<8x512xbf16>, vector<512x512xbf16>, vector<8x512xf32> -> vector<8x512xf32>
    %c0_15 = arith.constant 0 : index
    %c0_16 = arith.constant 0 : index
    %20 = vector.load %arg7[%c0_15, %c0_16] : memref<1x512xf32, #tpu.memory_space<vmem>>, vector<1x512xf32>
    %21 = vector.broadcast %20 : vector<1x512xf32> to vector<8x512xf32>
    %22 = arith.addf %19, %21 : vector<8x512xf32>
    %c0_17 = arith.constant 0 : index
    %c0_18 = arith.constant 0 : index
    %23 = vector.load %arg8[%c0_17, %c0_18] : memref<8x512xf32, #tpu.memory_space<vmem>>, vector<8x512xf32>
    tpu.vector_store %arg8[%c0_17, %c0_18], %22 {strides = array<i32>} : memref<8x512xf32, #tpu.memory_space<vmem>>, vector<8x512xf32>,
    return
  }
  func.func @transform_0(%arg0: i32) -> (i32, i32) {
    %c0_i32 = arith.constant 0 : i32
    %c0_i32_0 = arith.constant 0 : i32
    return %arg0, %c0_i32 : i32, i32
  }
  func.func @transform_1(%arg0: i32) -> (i32, i32) {
    %c0_i32 = arith.constant 0 : i32
    %c0_i32_0 = arith.constant 0 : i32
    %c0_i32_1 = arith.constant 0 : i32
    return %c0_i32, %c0_i32_0 : i32, i32
  }
  func.func @transform_2(%arg0: i32) -> (i32, i32) {
    %c0_i32 = arith.constant 0 : i32
    %c0_i32_0 = arith.constant 0 : i32
    %c0_i32_1 = arith.constant 0 : i32
    return %c0_i32, %c0_i32_0 : i32, i32
  }
  func.func @transform_3(%arg0: i32) -> (i32, i32) {
    %c0_i32 = arith.constant 0 : i32
    %c0_i32_0 = arith.constant 0 : i32
    %c0_i32_1 = arith.constant 0 : i32
    return %c0_i32, %c0_i32_0 : i32, i32
  }
  func.func @transform_4(%arg0: i32) -> (i32, i32) {
    %c0_i32 = arith.constant 0 : i32
    %c0_i32_0 = arith.constant 0 : i32
    %c0_i32_1 = arith.constant 0 : i32
    return %c0_i32, %c0_i32_0 : i32, i32
  }
  func.func @transform_5(%arg0: i32) -> (i32, i32) {
    %c0_i32 = arith.constant 0 : i32
    %c0_i32_0 = arith.constant 0 : i32
    %c0_i32_1 = arith.constant 0 : i32
    return %c0_i32, %c0_i32_0 : i32, i32
  }
  func.func @transform_6(%arg0: i32) -> (i32, i32) {
    %c0_i32 = arith.constant 0 : i32
    %c0_i32_0 = arith.constant 0 : i32
    %c0_i32_1 = arith.constant 0 : i32
    return %c0_i32, %c0_i32_0 : i32, i32
  }
  func.func @transform_7(%arg0: i32) -> (i32, i32) {
    %c0_i32 = arith.constant 0 : i32
    %c0_i32_0 = arith.constant 0 : i32
    return %arg0, %c0_i32 : i32, i32
  }
}

</mosaic_0001>

<bundles_post_ra>
// kernel: tpu_custom_call.1
= control target key start
LH: loop header
LB: loop body
LE: loop exit
PB: predicated region body
PF: predicated region fallthrough
CT: control target
= control target key end

     0   :  { %12 = vsyncpa [#allocation3], 0  ;;  %s1942_s0 = inlined_call_operand.hbm [shape: f32[8,32], index: 0, kind: input, shape index: {}]   ;;  %s1943_s1 = inlined_call_operand.hbm [shape: bf16[32,32], index: 1, kind: input, shape index: {}]   ;;  %s1944_s2 = inlined_call_operand.vmem [shape: f32[1,32], index: 2, kind: input, shape index: {}]   ;;  %s1945_s3 = inlined_call_operand.hbm [shape: bf16[32,512], index: 3, kind: input, shape index: {}]   ;;  %s1946_s4 = inlined_call_operand.vmem [shape: f32[1,512], index: 4, kind: input, shape index: {}]   ;;  %s1947_s5 = inlined_call_operand.hbm [shape: bf16[512,512], index: 5, kind: input, shape index: {}]   ;;  %s1948_s6 = inlined_call_operand.vmem [shape: f32[1,512], index: 6, kind: input, shape index: {}]   ;;  %s1949_s7 = inlined_call_operand.hbm [shape: f32[8,512], index: 7, kind: output, shape index: {}]  }
   0x1   :  { %13 = vsyncpa [#allocation6], 0 }
   0x2   :  { %14 = vsyncpa [#allocation9], 0 }
   0x3   :  { %15 = vsyncpa [#allocation4], 0  ;;  %s1791_s24 = smov [#allocation5]   ;;  %s1673_s28 = scalar_lea.hbm %s1943_s1, 256 }
   0x4   :  { %s31_s25 = sshll.u32 %s1791_s24, 4  ;;  %p1674_p0 = scmp.ne.s32.totalorder %s1943_s1, %s1673_s28  ;;  %s32_s25 = int_to_ptr.vmem [resolvable:$true] %s31_s25 }
   0x5   :  { %p1677_p1 = scmp.lt.u32.totalorder %s1673_s28, %s1943_s1 }
   0x7   :  { %p1679_p2 = pnand %p1677_p1, %p1674_p0 }
   0x9   :  { %1682 = shalt.err (!%p1679_p2)
}
   0xa   :  { %s1683_s10 = scalar_lea.vmem %s32_s25, 256  ;;  %p1688_p4 = scmp.lt.s32.totalorder %s32_s25, %s32_s25 }
   0xb   :  { %p1684_p3 = scmp.ne.s32.totalorder %s32_s25, %s1683_s10  ;;  %p1689_p5 = scmp.lt.s32.totalorder %s1683_s10, %s1683_s10 }
   0xd   :  { %p1690_p6 = por %p1689_p5, %p1688_p4 }
   0xf   :  { %p1691_p7 = pnand %p1690_p6, %p1684_p3 }
  0x11   :  { %1694 = shalt.err (!%p1691_p7)
}
  0x12   :  { %s1792_s11 = smov 64   ;;  %s1793_s12 = smov 4  }
  0x13   :  { %37 = dma.hbm_to_vmem [thread:$0]  %s1943_s1, 256, %s32_s25, [#allocation6], %s1792_s11, %s1792_s11, %s1793_s12  }
  0x14   :  { %s1794_s15 = smov [#allocation2]   ;;  %s1795_s17 = smov [#allocation7]  }
  0x15   :  { %s22_s16 = sshll.u32 %s1794_s15, 4  ;;  %s45_s18 = sshll.u32 %s1795_s17, 4  ;;  %s23_s16 = int_to_ptr.vmem [resolvable:$true] %s22_s16  ;;  %s46_s18 = int_to_ptr.vmem [resolvable:$true] %s45_s18 }
  0x16   :  { %s1695_s21 = scalar_lea.hbm %s1942_s0, 128 }
  0x17   :  { %p1696_p8 = scmp.ne.s32.totalorder %s1942_s0, %s1695_s21  ;;  %p1699_p9 = scmp.lt.u32.totalorder %s1695_s21, %s1942_s0 }
  0x19   :  { %p1701_p10 = pnand %p1699_p9, %p1696_p8 }
  0x1b   :  { %1704 = shalt.err (!%p1701_p10)
}
  0x1c   :  { %s1705_s1 = scalar_lea.vmem %s23_s16, 128  ;;  %p1710_p12 = scmp.lt.s32.totalorder %s23_s16, %s23_s16 }
  0x1d   :  { %p1706_p11 = scmp.ne.s32.totalorder %s23_s16, %s1705_s1  ;;  %p1711_p13 = scmp.lt.s32.totalorder %s1705_s1, %s1705_s1 }
  0x1f   :  { %p1712_p0 = por %p1711_p13, %p1710_p12 }
  0x21   :  { %p1713_p1 = pnand %p1712_p0, %p1706_p11 }
  0x23   :  { %1716 = shalt.err (!%p1713_p1)
}
  0x24   :  { %25 = dma.hbm_to_vmem [thread:$0]  %s1942_s0, 128, %s23_s16, [#allocation3]  }
  0x25   :  { %s1717_s30 = scalar_lea.hbm %s1945_s3, 1024 }
  0x26   :  { %p1718_p2 = scmp.ne.s32.totalorder %s1945_s3, %s1717_s30  ;;  %p1721_p3 = scmp.lt.u32.totalorder %s1717_s30, %s1945_s3 }
  0x28   :  { %p1723_p4 = pnand %p1721_p3, %p1718_p2 }
  0x2a   :  { %1726 = shalt.err (!%p1723_p4)
}
  0x2b   :  { %s1727_s12 = scalar_lea.vmem %s46_s18, 1024  ;;  %p1732_p6 = scmp.lt.s32.totalorder %s46_s18, %s46_s18 }
  0x2c   :  { %p1728_p5 = scmp.ne.s32.totalorder %s46_s18, %s1727_s12  ;;  %p1733_p7 = scmp.lt.s32.totalorder %s1727_s12, %s1727_s12 }
  0x2e   :  { %p1734_p8 = por %p1733_p7, %p1732_p6 }
  0x30   :  { %p1735_p9 = pnand %p1734_p8, %p1728_p5 }
  0x32   :  { %1738 = shalt.err (!%p1735_p9)
}
  0x33   :  { %s1796_s0 = smov 256   ;;  %s1797_s13 = smov 16  }
  0x34   :  { %51 = dma.hbm_to_vmem [thread:$0]  %s1945_s3, 1024, %s46_s18, [#allocation6], %s1796_s0, %s1796_s0, %s1797_s13  }
  0x35   :  { %s1798_s16 = smov [#allocation8]   ;;  %s1739_s21 = scalar_lea.hbm %s1947_s5, 16384 }
  0x36   :  { %s59_s17 = sshll.u32 %s1798_s16, 4  ;;  %p1740_p10 = scmp.ne.s32.totalorder %s1947_s5, %s1739_s21  ;;  %s60_s17 = int_to_ptr.vmem [resolvable:$true] %s59_s17 }
  0x37   :  { %p1743_p11 = scmp.lt.u32.totalorder %s1739_s21, %s1947_s5 }
  0x39   :  { %p1745_p12 = pnand %p1743_p11, %p1740_p10 }
  0x3b   :  { %1748 = shalt.err (!%p1745_p12)
}
  0x3c   :  { %s1749_s1 = scalar_lea.vmem %s60_s17, 16384  ;;  %p1754_p0 = scmp.lt.s32.totalorder %s60_s17, %s60_s17 }
  0x3d   :  { %p1750_p13 = scmp.ne.s32.totalorder %s60_s17, %s1749_s1  ;;  %p1755_p1 = scmp.lt.s32.totalorder %s1749_s1, %s1749_s1 }
  0x3f   :  { %p1756_p2 = por %p1755_p1, %p1754_p0 }
  0x41   :  { %p1757_p3 = pnand %p1756_p2, %p1750_p13 }
  0x43   :  { %1760 = shalt.err (!%p1757_p3)
}
  0x44   :  { %65 = dma.hbm_to_vmem [thread:$0]  %s1947_s5, 16384, %s60_s17, [#allocation9], %s1796_s0, %s1796_s0, %s1797_s13  }
  0x45   :  { %1783 = dma.done.wait [#allocation3], 128  }
  0x46   :  { %1784 = vsyncadd [#allocation3], 4294967168 }
  0x47   :  { %1785 = dma.done.wait [#allocation6], 1280  }
  0x48   :  { %1786 = vsyncadd [#allocation6], 4294966016 }
  0x49   :  { %1787 = dma.done.wait [#allocation9], 16384  }
  0x4a   :  { %1788 = vsyncadd [#allocation9], 4294950912  ;;  %v1799_v0 = vmov 0.0   ;;  %vm1800_vm0 = vmmov 0   ;;  %v1467_v1 = vld [vmem:[#allocation5] sm:$0xff]   ;;  %v1468_v2 = vld [vmem:[#allocation5 + $0x8] sm:$0xff]  }
  0x4b   :  { %1435 = vmatprep.subr.bf16.mxu0 %v1799_v0  ;;  %1439 = vmatprep.mubr.msk.bf16.mxu0 %vm1800_vm0, %v1799_v0  ;;  %v81_v3 = vld [vmem:[#allocation2] sm:$0xff]  ;;  %v1469_v4 = vld [vmem:[#allocation7 + $0x4] ss:$16 sps:$4 sm:$0xff]   ;;  %vm106_vm1 = vcmask 261120   ;;  %v1474_v8 = vld [vmem:[#allocation7] ss:$16 sps:$4 sm:$0xff]  }
  0x4c   :  { %1436 = vmatpush3.bf16.msra.mxu0 %v1467_v1  ;;  %v1471_v5 = vld [vmem:[#allocation7 + $0x8] ss:$16 sps:$4 sm:$0xff]   ;;  %v1473_v6 = vld [vmem:[#allocation7 + $0xc] ss:$16 sps:$4 sm:$0xff]   ;;  %v82_v7 = vpack.c.bf16 %v81_v3, %v81_v3  ;;  %225 = vmatprep.subr.bf16.mxu1 %v1469_v4  ;;  %v1475_v9 = vld [vmem:[#allocation7 + $0x24] ss:$16 sps:$4 sm:$0xff]  }
  0x4d   :  { %1437 = vmatprep.subr.bf16.mxu0 %v1799_v0  ;;  %226 = vmatpush1.bf16.msra.mxu1 %v1474_v8  ;;  %v1479_v10 = vld [vmem:[#allocation7 + $0x2c] ss:$16 sps:$4 sm:$0xff]   ;;  %v1477_v11 = vld [vmem:[#allocation7 + $0x28] ss:$16 sps:$4 sm:$0xff]   ;;  %v1480_v12 = vld [vmem:[#allocation7 + $0x20] ss:$16 sps:$4 sm:$0xff]  }
  0x4e   :  { %227 = vmatprep.subr.bf16.mxu1 %v1475_v9  ;;  %v1801_v13 = vmov 0   ;;  %v1483_v14 = vld [vmem:[#allocation8 + $0x4] ss:$16 sps:$4 sm:$0xff]   ;;  %v1486_v15 = vld [vmem:[#allocation8 + $0xc] ss:$16 sps:$4 sm:$0xff]   ;;  %s1802_s29 = smov [#allocation10]  }
  0x4f   :  { %257 = vmatprep.mubr.bf16.mxu1 %v1801_v13  ;;  %v1290_v16 = vld [vmem:[%s1944_s2] ss:$0 sm:$0xff]  ;;  %v1481_v23 = vld [vmem:[#allocation8] ss:$16 sps:$4 sm:$0xff]   ;;  %v1489_v26 = vld [vmem:[#allocation8 + $0x24] ss:$16 sps:$4 sm:$0xff]  }
  0x50   :  { %1438 = vmatpush3.bf16.msra.mxu0 %v1468_v2  ;;  %v1484_v24 = vld [vmem:[#allocation8 + $0x8] ss:$16 sps:$4 sm:$0xff]   ;;  %v1492_v27 = vld [vmem:[#allocation8 + $0x2c] ss:$16 sps:$4 sm:$0xff]   ;;  %v1487_v28 = vld [vmem:[#allocation8 + $0x20] ss:$16 sps:$4 sm:$0xff]  }
  0x51   :  { %266 = vmatprep.subr.bf16.mxu0 %v1473_v6  ;;  %228 = vmatpush1.bf16.msra.mxu1 %v1480_v12  ;;  %v1490_v29 = vld [vmem:[#allocation8 + $0x28] ss:$16 sps:$4 sm:$0xff]   ;;  %v1495_v30 = vld [vmem:[#allocation8 + $0x44] ss:$16 sps:$4 sm:$0xff]   ;;  %v1498_v31 = vld [vmem:[#allocation8 + $0x4c] ss:$16 sps:$4 sm:$0xff]  }
  0x52   :  { %1105 = vmatprep.subr.bf16.mxu1 %v1483_v14  ;;  %v1493_v32 = vld [vmem:[#allocation8 + $0x40] ss:$16 sps:$4 sm:$0xff]   ;;  %v1496_v33 = vld [vmem:[#allocation8 + $0x48] ss:$16 sps:$4 sm:$0xff]   ;;  %v1501_v34 = vld [vmem:[#allocation8 + $0x64] ss:$16 sps:$4 sm:$0xff]  }
  0x53   :  { %1440 = vmatmul.mubr.msk.bf16.vlgmr.msra.gmra.mrb[0].mxu0 %vm106_vm1, %v82_v7  ;;  %v1504_v35 = vld [vmem:[#allocation8 + $0x6c] ss:$16 sps:$4 sm:$0xff]   ;;  %v1499_v36 = vld [vmem:[#allocation8 + $0x60] ss:$16 sps:$4 sm:$0xff]   ;;  %v1502_v37 = vld [vmem:[#allocation8 + $0x68] ss:$16 sps:$4 sm:$0xff]  }
  0x54   :  { %267 = vmatpush1.bf16.msra.mxu0 %v1471_v5  ;;  %298 = vmatprep.mubr.bf16.mxu0 %v1801_v13  ;;  %v1507_v38 = vld [vmem:[#allocation8 + $0x84] ss:$16 sps:$4 sm:$0xff]   ;;  %v1510_v39 = vld [vmem:[#allocation8 + $0x8c] ss:$16 sps:$4 sm:$0xff]   ;;  %v1505_v40 = vld [vmem:[#allocation8 + $0x80] ss:$16 sps:$4 sm:$0xff]  }
  0x55   :  { %268 = vmatprep.subr.bf16.mxu0 %v1479_v10  ;;  %v1508_v41 = vld [vmem:[#allocation8 + $0x88] ss:$16 sps:$4 sm:$0xff]   ;;  %v1513_v42 = vld [vmem:[#allocation8 + $0xa4] ss:$16 sps:$4 sm:$0xff]   ;;  %v1516_v43 = vld [vmem:[#allocation8 + $0xac] ss:$16 sps:$4 sm:$0xff]  }
  0x56   :  { %v1511_v44 = vld [vmem:[#allocation8 + $0xa0] ss:$16 sps:$4 sm:$0xff]   ;;  %v1514_v45 = vld [vmem:[#allocation8 + $0xa8] ss:$16 sps:$4 sm:$0xff]   ;;  %v1519_v46 = vld [vmem:[#allocation8 + $0xc4] ss:$16 sps:$4 sm:$0xff]  }
  0x57   :  { %v1522_v47 = vld [vmem:[#allocation8 + $0xcc] ss:$16 sps:$4 sm:$0xff]   ;;  %v1517_v48 = vld [vmem:[#allocation8 + $0xc0] ss:$16 sps:$4 sm:$0xff]   ;;  %v1520_v49 = vld [vmem:[#allocation8 + $0xc8] ss:$16 sps:$4 sm:$0xff]  }
  0x58   :  { %269 = vmatpush1.bf16.msra.mxu0 %v1477_v11  ;;  %v1525_v50 = vld [vmem:[#allocation8 + $0xe4] ss:$16 sps:$4 sm:$0xff]   ;;  %v1528_v51 = vld [vmem:[#allocation8 + $0xec] ss:$16 sps:$4 sm:$0xff]   ;;  %v1523_v52 = vld [vmem:[#allocation8 + $0xe0] ss:$16 sps:$4 sm:$0xff]  }
  0x59   :  { %1187 = vmatprep.subr.bf16.mxu0 %v1486_v15  ;;  %v1526_v53 = vld [vmem:[#allocation8 + $0xe8] ss:$16 sps:$4 sm:$0xff]   ;;  %v1531_v54 = vld [vmem:[#allocation8 + $0x104] ss:$16 sps:$4 sm:$0xff]   ;;  %v1534_v55 = vld [vmem:[#allocation8 + $0x10c] ss:$16 sps:$4 sm:$0xff]  }
  0x5a   :  { %v1529_v56 = vld [vmem:[#allocation8 + $0x100] ss:$16 sps:$4 sm:$0xff]   ;;  %v1532_v57 = vld [vmem:[#allocation8 + $0x108] ss:$16 sps:$4 sm:$0xff]   ;;  %v1537_v58 = vld [vmem:[#allocation8 + $0x124] ss:$16 sps:$4 sm:$0xff]  }
  0x5b   :  { %v1540_v59 = vld [vmem:[#allocation8 + $0x12c] ss:$16 sps:$4 sm:$0xff]   ;;  %v1535_v60 = vld [vmem:[#allocation8 + $0x120] ss:$16 sps:$4 sm:$0xff]   ;;  %v1538_v61 = vld [vmem:[#allocation8 + $0x128] ss:$16 sps:$4 sm:$0xff]  }
  0x5c   :  { %v1543_v62 = vld [vmem:[#allocation8 + $0x144] ss:$16 sps:$4 sm:$0xff]   ;;  %v1546_v63 = vld [vmem:[#allocation8 + $0x14c] ss:$16 sps:$4 sm:$0xff]   ;;  %v1541_v0 = vld [vmem:[#allocation8 + $0x140] ss:$16 sps:$4 sm:$0xff]  }
  0x5d   :  { %v1544_v1 = vld [vmem:[#allocation8 + $0x148] ss:$16 sps:$4 sm:$0xff]   ;;  %v1549_v2 = vld [vmem:[#allocation8 + $0x164] ss:$16 sps:$4 sm:$0xff]   ;;  %v1552_v3 = vld [vmem:[#allocation8 + $0x16c] ss:$16 sps:$4 sm:$0xff]  }
  0x5e   :  { %v1547_v4 = vld [vmem:[#allocation8 + $0x160] ss:$16 sps:$4 sm:$0xff]   ;;  %v1550_v5 = vld [vmem:[#allocation8 + $0x168] ss:$16 sps:$4 sm:$0xff]   ;;  %v1555_v6 = vld [vmem:[#allocation8 + $0x184] ss:$16 sps:$4 sm:$0xff]  }
  0x5f   :  { %v1558_v7 = vld [vmem:[#allocation8 + $0x18c] ss:$16 sps:$4 sm:$0xff]   ;;  %v1553_v8 = vld [vmem:[#allocation8 + $0x180] ss:$16 sps:$4 sm:$0xff]   ;;  %v1556_v9 = vld [vmem:[#allocation8 + $0x188] ss:$16 sps:$4 sm:$0xff]  }
  0x60   :  { %v1561_v10 = vld [vmem:[#allocation8 + $0x1a4] ss:$16 sps:$4 sm:$0xff]   ;;  %v1564_v11 = vld [vmem:[#allocation8 + $0x1ac] ss:$16 sps:$4 sm:$0xff]   ;;  %v1559_v12 = vld [vmem:[#allocation8 + $0x1a0] ss:$16 sps:$4 sm:$0xff]  }
  0x61   :  { %v1562_v13 = vld [vmem:[#allocation8 + $0x1a8] ss:$16 sps:$4 sm:$0xff]   ;;  %v1567_v14 = vld [vmem:[#allocation8 + $0x1c4] ss:$16 sps:$4 sm:$0xff]   ;;  %v1570_v15 = vld [vmem:[#allocation8 + $0x1cc] ss:$16 sps:$4 sm:$0xff]  }
  0x62   :  { %s1279_s30 = sshll.u32 %s1802_s29, 4  ;;  %s1280_s30 = int_to_ptr.vmem [resolvable:$true] %s1279_s30 }
  0x63   :  { %p1766_p5 = scmp.lt.s32.totalorder %s1280_s30, %s1280_s30 }
 0x126   :  { %v144_v17 = vpop.f32.mrb[0].mxu0 }
 0x127   :  { %v145_v18 = vadd.f32 %v1290_v16, %v144_v17  ;;  %v1441_v19 = vpop.f32.mrb[1].mxu0  ;;  %v1565_v16 = vld [vmem:[#allocation8 + $0x1c0] ss:$16 sps:$4 sm:$0xff]   ;;  %v1568_v17 = vld [vmem:[#allocation8 + $0x1c8] ss:$16 sps:$4 sm:$0xff]  }
 0x128   :  { %v147_v20 = vpop.f32.mrb[2].mxu0  ;;  %v1576_v19 = vld [vmem:[#allocation8 + $0x1ec] ss:$16 sps:$4 sm:$0xff]  }
 0x129   :  { %v150_v21 = vmax.f32 %v145_v18, 0.0  ;;  %v1442_v22 = vpop.f32.mrb[3].mxu0  ;;  %v1573_v18 = vld [vmem:[#allocation8 + $0x1e4] ss:$16 sps:$4 sm:$0xff]   ;;  %v1571_v20 = vld [vmem:[#allocation8 + $0x1e0] ss:$16 sps:$4 sm:$0xff]  }
 0x12a   :  { %v1579_v22 = vld [vmem:[#allocation8 + $0x204] ss:$16 sps:$4 sm:$0xff]  }
 0x12b   :  { %v151_v25 = vpack.c.bf16 %v150_v21, %v150_v21  ;;  %v1574_v21 = vld [vmem:[#allocation8 + $0x1e8] ss:$16 sps:$4 sm:$0xff]  }
 0x12d   :  { %1302 = vmatmul.mubr.msk.bf16.vlgmr.msra.gmra.mrb[0].mxu1 %vm106_vm1, %v151_v25  ;;  %1303 = vmatmul.mubr.msk.bf16.vlgmr.msra.gmra.mrb[4].mxu0 %vm106_vm1, %v151_v25 }
 0x12e   :  { %1106 = vmatpush1.bf16.msra.mxu1 %v1481_v23  ;;  %1188 = vmatpush1.bf16.msra.mxu0 %v1484_v24  ;;  %v1582_v23 = vld [vmem:[#allocation8 + $0x20c] ss:$16 sps:$4 sm:$0xff]   ;;  %v162_v24 = vlaneseq }
 0x12f   :  { %1107 = vmatprep.subr.bf16.mxu1 %v1489_v26  ;;  %1189 = vmatprep.subr.bf16.mxu0 %v1492_v27  ;;  %v1903_v27 = vld [vmem:[%s1946_s4] sm:$0xf] }
 0x130   :  { %v1897_v25 = vshrl.u32 %v162_v24, 7  ;;  %v1639_v24 = vld [vmem:[#allocation8 + $0x344] ss:$16 sps:$4 sm:$0xff]  }
 0x132   :  { %1108 = vmatpush1.bf16.msra.mxu1 %v1487_v28  ;;  %1190 = vmatpush1.bf16.msra.mxu0 %v1490_v29  ;;  %v164_v26 = vsub.s32 0, %v1897_v25  ;;  %v168_v28 = vsub.s32 1, %v1897_v25  ;;  %v176_v29 = vsub.s32 3, %v1897_v25 }
 0x133   :  { %1109 = vmatprep.subr.bf16.mxu1 %v1495_v30  ;;  %1191 = vmatprep.subr.bf16.mxu0 %v1498_v31 }
 0x134   :  { %v165_v30 = vrot.slane %v1903_v27, %v164_v26  ;;  %v169_v31 = vrot.slane %v1903_v27, %v168_v28 }
 0x136   :  { %1110 = vmatpush1.bf16.msra.mxu1 %v1493_v32  ;;  %1192 = vmatpush1.bf16.msra.mxu0 %v1496_v33  ;;  %v177_v32 = vrot.slane %v1903_v27, %v176_v29 }
 0x137   :  { %1111 = vmatprep.subr.bf16.mxu1 %v1501_v34  ;;  %1193 = vmatprep.subr.bf16.mxu0 %v1504_v35 }
 0x13a   :  { %1112 = vmatpush1.bf16.msra.mxu1 %v1499_v36  ;;  %1194 = vmatpush1.bf16.msra.mxu0 %v1502_v37 }
 0x13b   :  { %1113 = vmatprep.subr.bf16.mxu1 %v1507_v38  ;;  %1195 = vmatprep.subr.bf16.mxu0 %v1510_v39 }
 0x13e   :  { %1114 = vmatpush1.bf16.msra.mxu1 %v1505_v40  ;;  %1196 = vmatpush1.bf16.msra.mxu0 %v1508_v41 }
 0x13f   :  { %1115 = vmatprep.subr.bf16.mxu1 %v1513_v42  ;;  %1197 = vmatprep.subr.bf16.mxu0 %v1516_v43 }
 0x142   :  { %1116 = vmatpush1.bf16.msra.mxu1 %v1511_v44  ;;  %1198 = vmatpush1.bf16.msra.mxu0 %v1514_v45 }
 0x143   :  { %1117 = vmatprep.subr.bf16.mxu1 %v1519_v46  ;;  %1199 = vmatprep.subr.bf16.mxu0 %v1522_v47 }
 0x146   :  { %1118 = vmatpush1.bf16.msra.mxu1 %v1517_v48  ;;  %1200 = vmatpush1.bf16.msra.mxu0 %v1520_v49  ;;  %v1577_v48 = vld [vmem:[#allocation8 + $0x200] ss:$16 sps:$4 sm:$0xff]   ;;  %v1580_v49 = vld [vmem:[#allocation8 + $0x208] ss:$16 sps:$4 sm:$0xff]  }
 0x147   :  { %1119 = vmatprep.subr.bf16.mxu1 %v1525_v50  ;;  %1201 = vmatprep.subr.bf16.mxu0 %v1528_v51  ;;  %v1585_v51 = vld [vmem:[#allocation8 + $0x224] ss:$16 sps:$4 sm:$0xff]  }
 0x14a   :  { %1120 = vmatpush1.bf16.msra.mxu1 %v1523_v52  ;;  %1202 = vmatpush1.bf16.msra.mxu0 %v1526_v53  ;;  %v1588_v52 = vld [vmem:[#allocation8 + $0x22c] ss:$16 sps:$4 sm:$0xff]  }
 0x14b   :  { %1121 = vmatprep.subr.bf16.mxu1 %v1531_v54  ;;  %1203 = vmatprep.subr.bf16.mxu0 %v1534_v55  ;;  %v1583_v54 = vld [vmem:[#allocation8 + $0x220] ss:$16 sps:$4 sm:$0xff]   ;;  %v1586_v55 = vld [vmem:[#allocation8 + $0x228] ss:$16 sps:$4 sm:$0xff]  }
 0x14e   :  { %1122 = vmatpush1.bf16.msra.mxu1 %v1529_v56  ;;  %1204 = vmatpush1.bf16.msra.mxu0 %v1532_v57  ;;  %v1591_v56 = vld [vmem:[#allocation8 + $0x244] ss:$16 sps:$4 sm:$0xff]   ;;  %v1594_v57 = vld [vmem:[#allocation8 + $0x24c] ss:$16 sps:$4 sm:$0xff]  }
 0x14f   :  { %1123 = vmatprep.subr.bf16.mxu1 %v1537_v58  ;;  %1205 = vmatprep.subr.bf16.mxu0 %v1540_v59  ;;  %v1589_v58 = vld [vmem:[#allocation8 + $0x240] ss:$16 sps:$4 sm:$0xff]   ;;  %v1592_v59 = vld [vmem:[#allocation8 + $0x248] ss:$16 sps:$4 sm:$0xff]  }
 0x152   :  { %1124 = vmatpush1.bf16.msra.mxu1 %v1535_v60  ;;  %1206 = vmatpush1.bf16.msra.mxu0 %v1538_v61  ;;  %v1597_v60 = vld [vmem:[#allocation8 + $0x264] ss:$16 sps:$4 sm:$0xff]   ;;  %v1600_v61 = vld [vmem:[#allocation8 + $0x26c] ss:$16 sps:$4 sm:$0xff]  }
 0x153   :  { %1125 = vmatprep.subr.bf16.mxu1 %v1543_v62  ;;  %1207 = vmatprep.subr.bf16.mxu0 %v1546_v63  ;;  %v1595_v62 = vld [vmem:[#allocation8 + $0x260] ss:$16 sps:$4 sm:$0xff]   ;;  %v1598_v63 = vld [vmem:[#allocation8 + $0x268] ss:$16 sps:$4 sm:$0xff]  }
 0x156   :  { %1126 = vmatpush1.bf16.msra.mxu1 %v1541_v0  ;;  %1208 = vmatpush1.bf16.msra.mxu0 %v1544_v1  ;;  %v1603_v0 = vld [vmem:[#allocation8 + $0x284] ss:$16 sps:$4 sm:$0xff]   ;;  %v1606_v1 = vld [vmem:[#allocation8 + $0x28c] ss:$16 sps:$4 sm:$0xff]  }
 0x157   :  { %1127 = vmatprep.subr.bf16.mxu1 %v1549_v2  ;;  %1209 = vmatprep.subr.bf16.mxu0 %v1552_v3  ;;  %v1601_v2 = vld [vmem:[#allocation8 + $0x280] ss:$16 sps:$4 sm:$0xff]   ;;  %v1604_v3 = vld [vmem:[#allocation8 + $0x288] ss:$16 sps:$4 sm:$0xff]  }
 0x15a   :  { %1128 = vmatpush1.bf16.msra.mxu1 %v1547_v4  ;;  %1210 = vmatpush1.bf16.msra.mxu0 %v1550_v5  ;;  %v1609_v4 = vld [vmem:[#allocation8 + $0x2a4] ss:$16 sps:$4 sm:$0xff]   ;;  %v1612_v5 = vld [vmem:[#allocation8 + $0x2ac] ss:$16 sps:$4 sm:$0xff]  }
 0x15b   :  { %1129 = vmatprep.subr.bf16.mxu1 %v1555_v6  ;;  %1211 = vmatprep.subr.bf16.mxu0 %v1558_v7  ;;  %v1607_v6 = vld [vmem:[#allocation8 + $0x2a0] ss:$16 sps:$4 sm:$0xff]   ;;  %v1610_v7 = vld [vmem:[#allocation8 + $0x2a8] ss:$16 sps:$4 sm:$0xff]  }
 0x15e   :  { %1130 = vmatpush1.bf16.msra.mxu1 %v1553_v8  ;;  %1212 = vmatpush1.bf16.msra.mxu0 %v1556_v9  ;;  %v1615_v8 = vld [vmem:[#allocation8 + $0x2c4] ss:$16 sps:$4 sm:$0xff]   ;;  %v1618_v9 = vld [vmem:[#allocation8 + $0x2cc] ss:$16 sps:$4 sm:$0xff]  }
 0x15f   :  { %1131 = vmatprep.subr.bf16.mxu1 %v1561_v10  ;;  %1213 = vmatprep.subr.bf16.mxu0 %v1564_v11  ;;  %v1613_v10 = vld [vmem:[#allocation8 + $0x2c0] ss:$16 sps:$4 sm:$0xff]   ;;  %v1616_v11 = vld [vmem:[#allocation8 + $0x2c8] ss:$16 sps:$4 sm:$0xff]  }
 0x162   :  { %1132 = vmatpush1.bf16.msra.mxu1 %v1559_v12  ;;  %1214 = vmatpush1.bf16.msra.mxu0 %v1562_v13  ;;  %v1621_v12 = vld [vmem:[#allocation8 + $0x2e4] ss:$16 sps:$4 sm:$0xff]   ;;  %v1624_v13 = vld [vmem:[#allocation8 + $0x2ec] ss:$16 sps:$4 sm:$0xff]  }
 0x163   :  { %1133 = vmatprep.subr.bf16.mxu1 %v1567_v14  ;;  %1215 = vmatprep.subr.bf16.mxu0 %v1570_v15  ;;  %v1619_v14 = vld [vmem:[#allocation8 + $0x2e0] ss:$16 sps:$4 sm:$0xff]   ;;  %v1622_v15 = vld [vmem:[#allocation8 + $0x2e8] ss:$16 sps:$4 sm:$0xff]  }
 0x166   :  { %1134 = vmatpush1.bf16.msra.mxu1 %v1565_v16  ;;  %1216 = vmatpush1.bf16.msra.mxu0 %v1568_v17  ;;  %v1627_v16 = vld [vmem:[#allocation8 + $0x304] ss:$16 sps:$4 sm:$0xff]   ;;  %v1630_v17 = vld [vmem:[#allocation8 + $0x30c] ss:$16 sps:$4 sm:$0xff]  }
 0x167   :  { %1135 = vmatprep.subr.bf16.mxu1 %v1573_v18  ;;  %1217 = vmatprep.subr.bf16.mxu0 %v1576_v19  ;;  %v1625_v18 = vld [vmem:[#allocation8 + $0x300] ss:$16 sps:$4 sm:$0xff]   ;;  %v1628_v19 = vld [vmem:[#allocation8 + $0x308] ss:$16 sps:$4 sm:$0xff]  }
 0x16a   :  { %1136 = vmatpush1.bf16.msra.mxu1 %v1571_v20  ;;  %1218 = vmatpush1.bf16.msra.mxu0 %v1574_v21  ;;  %v1633_v20 = vld [vmem:[#allocation8 + $0x324] ss:$16 sps:$4 sm:$0xff]   ;;  %v1636_v21 = vld [vmem:[#allocation8 + $0x32c] ss:$16 sps:$4 sm:$0xff]  }
 0x16b   :  { %1146 = vmatprep.subr.bf16.mxu1 %v1579_v22  ;;  %1228 = vmatprep.subr.bf16.mxu0 %v1582_v23  ;;  %v1631_v22 = vld [vmem:[#allocation8 + $0x320] ss:$16 sps:$4 sm:$0xff]   ;;  %v1634_v23 = vld [vmem:[#allocation8 + $0x328] ss:$16 sps:$4 sm:$0xff]  }
 0x200   :  { %v259_v33 = vpop.f32.mrb[0].mxu1  ;;  %v1916_v34 = vpop.f32.mrb[4].mxu0 }
 0x201   :  { %v260_v35 = vadd.f32 %v259_v33, %v165_v30  ;;  %v261_v36 = vpop.f32.mrb[1].mxu1  ;;  %v302_v37 = vpop.f32.mrb[5].mxu0  ;;  %v1642_v30 = vld [vmem:[#allocation8 + $0x34c] ss:$16 sps:$4 sm:$0xff]   ;;  %v1645_v33 = vld [vmem:[#allocation8 + $0x364] ss:$16 sps:$4 sm:$0xff]  }
 0x202   :  { %v262_v38 = vadd.f32 %v261_v36, %v169_v31  ;;  %v303_v39 = vadd.f32 %v302_v37, %v177_v32  ;;  %v263_v40 = vpop.f32.mrb[2].mxu1  ;;  %v304_v41 = vpop.f32.mrb[6].mxu0  ;;  %v1637_v31 = vld [vmem:[#allocation8 + $0x340] ss:$16 sps:$4 sm:$0xff]   ;;  %v1640_v32 = vld [vmem:[#allocation8 + $0x348] ss:$16 sps:$4 sm:$0xff]  }
 0x203   :  { %v307_v42 = vmax.f32 %v260_v35, 0.0  ;;  %v264_v43 = vpop.f32.mrb[3].mxu1  ;;  %v305_v44 = vpop.f32.mrb[7].mxu0  ;;  %v1648_v35 = vld [vmem:[#allocation8 + $0x36c] ss:$16 sps:$4 sm:$0xff]  }
 0x204   :  { %v308_v45 = vmax.f32 %v262_v38, 0.0  ;;  %v310_v46 = vmax.f32 %v303_v39, 0.0  ;;  %v1643_v36 = vld [vmem:[#allocation8 + $0x360] ss:$16 sps:$4 sm:$0xff]   ;;  %v1646_v37 = vld [vmem:[#allocation8 + $0x368] ss:$16 sps:$4 sm:$0xff]  }
 0x205   :  { %v311_v50 = vpack.c.bf16 %v307_v42, %v307_v42  ;;  %v1651_v38 = vld [vmem:[#allocation8 + $0x384] ss:$16 sps:$4 sm:$0xff]   ;;  %v1654_v39 = vld [vmem:[#allocation8 + $0x38c] ss:$16 sps:$4 sm:$0xff]   ;;  %v1649_v40 = vld [vmem:[#allocation8 + $0x380] ss:$16 sps:$4 sm:$0xff]  }
 0x206   :  { %v312_v47 = vpack.c.bf16 %v308_v45, %v308_v45  ;;  %v314_v53 = vpack.c.bf16 %v310_v46, %v310_v46  ;;  %v1652_v41 = vld [vmem:[#allocation8 + $0x388] ss:$16 sps:$4 sm:$0xff]   ;;  %v172_v42 = vsub.s32 2, %v1897_v25  ;;  %v1657_v43 = vld [vmem:[#allocation8 + $0x3a4] ss:$16 sps:$4 sm:$0xff]  }
 0x207   :  { %v1660_v44 = vld [vmem:[#allocation8 + $0x3ac] ss:$16 sps:$4 sm:$0xff]   ;;  %v1655_v45 = vld [vmem:[#allocation8 + $0x3a0] ss:$16 sps:$4 sm:$0xff]   ;;  %v1658_v46 = vld [vmem:[#allocation8 + $0x3a8] ss:$16 sps:$4 sm:$0xff]  }
 0x208   :  { %1137 = vmatprep.mubr.bf16.mxu1 %v312_v47  ;;  %1219 = vmatprep.mubr.bf16.mxu0 %v312_v47  ;;  %v173_v47 = vrot.slane %v1903_v27, %v172_v42 }
 0x209   :  { %1138 = vmatmul.mubr.bf16.vlgmr.msra.gmra.mrb[4].mxu1 %v311_v50  ;;  %1220 = vmatmul.mubr.bf16.vlgmr.msra.gmra.mrb[8].mxu0 %v311_v50  ;;  %v1661_v50 = vld [vmem:[#allocation8 + $0x3c0] ss:$16 sps:$4 sm:$0xff]  }
 0x20a   :  { %1147 = vmatpush1.bf16.msra.mxu1 %v1577_v48  ;;  %1229 = vmatpush1.bf16.msra.mxu0 %v1580_v49  ;;  %v1663_v48 = vld [vmem:[#allocation8 + $0x3c4] ss:$16 sps:$4 sm:$0xff]   ;;  %v1666_v49 = vld [vmem:[#allocation8 + $0x3cc] ss:$16 sps:$4 sm:$0xff]  }
 0x20b   :  { %1178 = vmatprep.mubr.bf16.mxu1 %v314_v53  ;;  %1260 = vmatprep.mubr.bf16.mxu0 %v314_v53  ;;  %v1669_v53 = vld [vmem:[#allocation8 + $0x3e4] ss:$16 sps:$4 sm:$0xff]  }
 0x20c   :  { %1148 = vmatprep.subr.bf16.mxu1 %v1585_v51  ;;  %1230 = vmatprep.subr.bf16.mxu0 %v1588_v52  ;;  %v1664_v51 = vld [vmem:[#allocation8 + $0x3c8] ss:$16 sps:$4 sm:$0xff]   ;;  %v301_v52 = vadd.f32 %v1916_v34, %v173_v47 }
 0x20d   :  { %v443_v34 = vld [vmem:[%s1948_s6] sm:$0xf]  ;;  %s1761_s6 = scalar_lea.vmem %s1280_s30, 512 }
 0x20e   :  { %1149 = vmatpush1.bf16.msra.mxu1 %v1583_v54  ;;  %1231 = vmatpush1.bf16.msra.mxu0 %v1586_v55  ;;  %v1672_v54 = vld [vmem:[#allocation8 + $0x3ec] ss:$16 sps:$4 sm:$0xff]   ;;  %v1667_v55 = vld [vmem:[#allocation8 + $0x3e0] ss:$16 sps:$4 sm:$0xff]   ;;  %p1762_p4 = scmp.ne.s32.totalorder %s1280_s30, %s1761_s6  ;;  %p1767_p6 = scmp.lt.s32.totalorder %s1761_s6, %s1761_s6 }
 0x20f   :  { %1150 = vmatprep.subr.bf16.mxu1 %v1591_v56  ;;  %1232 = vmatprep.subr.bf16.mxu0 %v1594_v57  ;;  %v1670_v56 = vld [vmem:[#allocation8 + $0x3e8] ss:$16 sps:$4 sm:$0xff]   ;;  %v309_v57 = vmax.f32 %v301_v52, 0.0 }
 0x210   :  { %p1768_p7 = por %p1767_p6, %p1766_p5 }
 0x211   :  { %v313_v27 = vpack.c.bf16 %v309_v57, %v309_v57 }
 0x212   :  { %1151 = vmatpush1.bf16.msra.mxu1 %v1589_v58  ;;  %1233 = vmatpush1.bf16.msra.mxu0 %v1592_v59  ;;  %v448_v58 = vrot.slane %v443_v34, %v164_v26  ;;  %v456_v59 = vrot.slane %v443_v34, %v172_v42  ;;  %p1769_p8 = pnand %p1768_p7, %p1762_p4 }
 0x213   :  { %1152 = vmatprep.subr.bf16.mxu1 %v1597_v60  ;;  %1234 = vmatprep.subr.bf16.mxu0 %v1600_v61  ;;  %v452_v60 = vrot.slane %v443_v34, %v168_v28  ;;  %v460_v61 = vrot.slane %v443_v34, %v176_v29 }
 0x216   :  { %1153 = vmatpush1.bf16.msra.mxu1 %v1595_v62  ;;  %1235 = vmatpush1.bf16.msra.mxu0 %v1598_v63 }
 0x217   :  { %1154 = vmatprep.subr.bf16.mxu1 %v1603_v0  ;;  %1236 = vmatprep.subr.bf16.mxu0 %v1606_v1 }
 0x21a   :  { %1155 = vmatpush1.bf16.msra.mxu1 %v1601_v2  ;;  %1237 = vmatpush1.bf16.msra.mxu0 %v1604_v3 }
 0x21b   :  { %1156 = vmatprep.subr.bf16.mxu1 %v1609_v4  ;;  %1238 = vmatprep.subr.bf16.mxu0 %v1612_v5 }
 0x21e   :  { %1157 = vmatpush1.bf16.msra.mxu1 %v1607_v6  ;;  %1239 = vmatpush1.bf16.msra.mxu0 %v1610_v7 }
 0x21f   :  { %1158 = vmatprep.subr.bf16.mxu1 %v1615_v8  ;;  %1240 = vmatprep.subr.bf16.mxu0 %v1618_v9 }
 0x222   :  { %1159 = vmatpush1.bf16.msra.mxu1 %v1613_v10  ;;  %1241 = vmatpush1.bf16.msra.mxu0 %v1616_v11 }
 0x223   :  { %1160 = vmatprep.subr.bf16.mxu1 %v1621_v12  ;;  %1242 = vmatprep.subr.bf16.mxu0 %v1624_v13 }
 0x226   :  { %1161 = vmatpush1.bf16.msra.mxu1 %v1619_v14  ;;  %1243 = vmatpush1.bf16.msra.mxu0 %v1622_v15 }
 0x227   :  { %1162 = vmatprep.subr.bf16.mxu1 %v1627_v16  ;;  %1244 = vmatprep.subr.bf16.mxu0 %v1630_v17 }
 0x22a   :  { %1163 = vmatpush1.bf16.msra.mxu1 %v1625_v18  ;;  %1245 = vmatpush1.bf16.msra.mxu0 %v1628_v19 }
 0x22b   :  { %1164 = vmatprep.subr.bf16.mxu1 %v1633_v20  ;;  %1246 = vmatprep.subr.bf16.mxu0 %v1636_v21 }
 0x22e   :  { %1165 = vmatpush1.bf16.msra.mxu1 %v1631_v22  ;;  %1247 = vmatpush1.bf16.msra.mxu0 %v1634_v23 }
 0x22f   :  { %1166 = vmatprep.subr.bf16.mxu1 %v1639_v24  ;;  %1248 = vmatprep.subr.bf16.mxu0 %v1642_v30 }
 0x232   :  { %1167 = vmatpush1.bf16.msra.mxu1 %v1637_v31  ;;  %1249 = vmatpush1.bf16.msra.mxu0 %v1640_v32 }
 0x233   :  { %1168 = vmatprep.subr.bf16.mxu1 %v1645_v33  ;;  %1250 = vmatprep.subr.bf16.mxu0 %v1648_v35 }
 0x236   :  { %1169 = vmatpush1.bf16.msra.mxu1 %v1643_v36  ;;  %1251 = vmatpush1.bf16.msra.mxu0 %v1646_v37 }
 0x237   :  { %1170 = vmatprep.subr.bf16.mxu1 %v1651_v38  ;;  %1252 = vmatprep.subr.bf16.mxu0 %v1654_v39 }
 0x23a   :  { %1171 = vmatpush1.bf16.msra.mxu1 %v1649_v40  ;;  %1253 = vmatpush1.bf16.msra.mxu0 %v1652_v41 }
 0x23b   :  { %1172 = vmatprep.subr.bf16.mxu1 %v1657_v43  ;;  %1254 = vmatprep.subr.bf16.mxu0 %v1660_v44 }
 0x23e   :  { %1173 = vmatpush1.bf16.msra.mxu1 %v1655_v45  ;;  %1255 = vmatpush1.bf16.msra.mxu0 %v1658_v46 }
 0x23f   :  { %1174 = vmatprep.subr.bf16.mxu1 %v1663_v48  ;;  %1256 = vmatprep.subr.bf16.mxu0 %v1666_v49 }
 0x242   :  { %1175 = vmatpush1.bf16.msra.mxu1 %v1661_v50  ;;  %1257 = vmatpush1.bf16.msra.mxu0 %v1664_v51 }
 0x243   :  { %1176 = vmatprep.subr.bf16.mxu1 %v1669_v53  ;;  %1258 = vmatprep.subr.bf16.mxu0 %v1672_v54 }
 0x246   :  { %1177 = vmatpush1.bf16.msra.mxu1 %v1667_v55  ;;  %1259 = vmatpush1.bf16.msra.mxu0 %v1670_v56 }
 0x249   :  { %1179 = vmatmul.mubr.bf16.vlgmr.msra.gmra.mrb[4].mxu1 %v313_v27  ;;  %1261 = vmatmul.mubr.bf16.vlgmr.msra.gmra.mrb[8].mxu0 %v313_v27 }
 0x31c   :  { %v1180_v62 = vpop.f32.mrb[4].mxu1  ;;  %v1262_v63 = vpop.f32.mrb[8].mxu0 }
 0x31d   :  { %v1443_v0 = vadd.f32 %v1180_v62, %v448_v58  ;;  %v1445_v1 = vadd.f32 %v1262_v63, %v456_v59  ;;  %v1182_v2 = vpop.f32.mrb[5].mxu1  ;;  %v1264_v3 = vpop.f32.mrb[9].mxu0 }
 0x31e   :  { %v1444_v4 = vadd.f32 %v1182_v2, %v452_v60  ;;  %v1446_v5 = vadd.f32 %v1264_v3, %v460_v61  ;;  %v1184_v6 = vpop.f32.mrb[6].mxu1  ;;  %v1266_v7 = vpop.f32.mrb[10].mxu0 }
 0x31f   :  { %1269 = vst [vmem:[#allocation10] sm:$0xff] %v1443_v0  ;;  %1271 = vst [vmem:[#allocation10 + $0x10] sm:$0xff] %v1445_v1  ;;  %v1185_v26 = vpop.f32.mrb[7].mxu1  ;;  %v1267_v28 = vpop.f32.mrb[11].mxu0 }
 0x320   :  { %1270 = vst [vmem:[#allocation10 + $0x8] sm:$0xff] %v1444_v4  ;;  %1272 = vst [vmem:[#allocation10 + $0x18] sm:$0xff] %v1446_v5 }
 0x321   :  { %1772 = shalt.err (!%p1769_p8)
}
 0x322   :  { %s1773_s10 = scalar_lea.hbm %s1949_s7, 512 }
 0x323   :  { %p1774_p9 = scmp.ne.s32.totalorder %s1949_s7, %s1773_s10  ;;  %p1777_p10 = scmp.lt.u32.totalorder %s1773_s10, %s1949_s7 }
 0x325   :  { %p1779_p11 = pnand %p1777_p10, %p1774_p9 }
 0x327   :  { %1782 = shalt.err (!%p1779_p11)
}
 0x328   :  { %1282 = dma.vmem_to_hbm [thread:$0]  %s1280_s30, 512, %s1949_s7, [#allocation4]  }
 0x329   :  { %1789 = dma.done.wait [#allocation4], 512  }
 0x32a   :  { %1790 = vsyncadd [#allocation4], 4294966784 }
 0x32b   :  { %1286 = vsyncpa [#allocation3], 1 }
 0x32c   :  { %1287 = vsyncpa [#allocation6], 1 }
 0x32d   :  { %1288 = vsyncpa [#allocation9], 1 }
 0x32e   :  { %1289 = vsyncpa [#allocation4], 1 }

</bundles_post_ra>
